<compile_context>
chip_gen: v6e
topology: v6e:2x2x1
jax: 0.10.0
libtpu: 0.0.40
codegen_flags: <defaults>
</compile_context>

<pallas_src>
import functools

import jax
import jax.numpy as jnp
from jax.experimental import pallas as pl
from jax.experimental.pallas import tpu as pltpu


# ------------------------------- helpers --------------------------------------
def _round_up(x, m):
    return ((x + m - 1) // m) * m


def _choose_k_tiling(K):
    """Pick (tk, K_pad) for the reduction dimension.

    Small K -> a single full-extent tile (the (8,128) full-dim exception).
    Large K -> tk must be a multiple of 128 so the (TM, tk) patches block stays
    lane-aligned; prefer the largest aligned divisor <= 1152 (fewest grid
    steps, still only ~1-2 MiB per buffered tile in bf16).
    """
    K8 = _round_up(K, 8)
    if K8 <= 1152:
        return K8, K8
    for cand in range(1152, 383, -128):
        if K8 % cand == 0:
            return cand, K8
    return 512, _round_up(K8, 512)


# ----------------------------- Pallas kernel ----------------------------------
def _mm_bias_act_kernel(x_ref, w_ref, b_ref, o_ref, acc_ref, *, act):
    """One (TM, tn) output tile: acc += x @ w over K tiles, then bias + act."""
    k = pl.program_id(2)

    @pl.when(k == 0)
    def _():
        acc_ref[...] = jnp.zeros_like(acc_ref)

    acc_ref[...] += jnp.dot(
        x_ref[...], w_ref[...], preferred_element_type=jnp.float32
    )

    @pl.when(k == pl.num_programs(2) - 1)
    def _():
        out = acc_ref[...] + b_ref[...]            # (TM, tn) + (1, tn), f32
        if act == "lrelu":
            out = jnp.where(out >= 0.0, out, 0.2 * out)
        elif act == "sigmoid":
            out = jax.nn.sigmoid(out)
        o_ref[...] = out.astype(o_ref.dtype)


def _matmul_bias_act(patches, w_mat, bias, act, out_dtype):
    """patches: [M, K], w_mat: [K, Cout], bias: [Cout] -> [M, Cout] (out_dtype)."""
    M, K = patches.shape
    K2, Cout = w_mat.shape
    assert K == K2

    # --- tile sizes / padded extents (lane- and sublane-aligned) ---
    Cout_pad = _round_up(Cout, 128)                 # lane-dense stores
    tn = 256 if Cout_pad % 256 == 0 else 128        # matches v6e/v7x MXU width
    tk, K_pad = _choose_k_tiling(K)
    TM = 512 if M >= 512 else _round_up(M, 8)
    M_pad = _round_up(M, TM)

    # --- cast to bf16 (MXU-native) and zero-pad to the tiled extents ---
    x_p = jnp.pad(patches.astype(jnp.bfloat16),
                  ((0, M_pad - M), (0, K_pad - K)))
    w_p = jnp.pad(w_mat.astype(jnp.bfloat16),
                  ((0, K_pad - K), (0, Cout_pad - Cout)))
    b_p = jnp.pad(bias.astype(jnp.float32),
                  (0, Cout_pad - Cout)).reshape(1, Cout_pad)

    grid = (M_pad // TM, Cout_pad // tn, K_pad // tk)
    n_m, n_n, _ = grid
    out_itemsize = jnp.dtype(out_dtype).itemsize
    cost = pl.CostEstimate(
        flops=2 * M_pad * K_pad * Cout_pad,
        transcendentals=(M_pad * Cout_pad) if act == "sigmoid" else 0,
        bytes_accessed=(M_pad * K_pad * 2 * n_n        # patches re-read per Cout tile
                        + K_pad * Cout_pad * 2 * n_m   # weights re-read per M tile
                        + Cout_pad * 4 * n_m
                        + M_pad * Cout_pad * out_itemsize),
    )

    kernel = functools.partial(_mm_bias_act_kernel, act=act)
    out = pl.pallas_call(
        kernel,
        out_shape=jax.ShapeDtypeStruct((M_pad, Cout_pad), out_dtype),
        grid_spec=pltpu.PrefetchScalarGridSpec(
            num_scalar_prefetch=0,
            grid=grid,
            in_specs=[
                pl.BlockSpec((TM, tk), lambda i, j, k: (i, k)),   # patches
                pl.BlockSpec((tk, tn), lambda i, j, k: (k, j)),   # weight
                pl.BlockSpec((1, tn), lambda i, j, k: (0, j)),    # bias
            ],
            out_specs=pl.BlockSpec((TM, tn), lambda i, j, k: (i, j)),
            scratch_shapes=[pltpu.VMEM((TM, tn), jnp.float32)],
        ),
        compiler_params=pltpu.CompilerParams(
            dimension_semantics=("parallel", "parallel", "arbitrary"),
            vmem_limit_bytes=48 * 1024 * 1024,   # explicit; safe on v7x's 64 MiB
        ),
        cost_estimate=cost,
    )(x_p, w_p, b_p)
    return out[:M, :Cout]


# -------------------------------- JAX glue -------------------------------------
def _im2col(x_nhwc, kh, kw, stride, pad):
    """Extract conv patches. Returns ([N*Ho*Wo, kh*kw*C], (N, Ho, Wo))."""
    x = jnp.pad(x_nhwc, ((0, 0), (pad, pad), (pad, pad), (0, 0)))
    N, H, W, C = x.shape
    Ho = (H - kh) // stride + 1
    Wo = (W - kw) // stride + 1
    cols = []
    for i in range(kh):
        for j in range(kw):
            cols.append(
                x[:, i:i + stride * Ho:stride, j:j + stride * Wo:stride, :]
            )
    patches = jnp.stack(cols, axis=3)           # [N, Ho, Wo, kh*kw, C]
    return patches.reshape(N * Ho * Wo, kh * kw * C), (N, Ho, Wo)


def _spectral_normalize(w, u):
    """PyTorch-style spectral norm: one power iteration on W.reshape(Cout, -1).

    Note: the updated `u` vector is not persisted (inference semantics).
    """
    wm = w.reshape(w.shape[0], -1)
    v = wm.T @ u
    v = v / (jnp.linalg.norm(v) + 1e-12)
    u_new = wm @ v
    u_new = u_new / (jnp.linalg.norm(u_new) + 1e-12)
    sigma = jnp.dot(u_new, wm @ v)
    return w / sigma


def _conv2d_sn(x_nhwc, w, b, u, stride, act, out_dtype):
    """Spectral-normalized 3x3 conv (padding=1) + fused bias/activation."""
    w = _spectral_normalize(w, u)               # [Cout, Cin, 3, 3], f32
    cout, cin, kh, kw = w.shape
    patches, (N, Ho, Wo) = _im2col(x_nhwc, kh, kw, stride, pad=1)
    # match patch ordering (kh, kw, Cin):
    w_mat = jnp.transpose(w, (2, 3, 1, 0)).reshape(kh * kw * cin, cout)
    out = _matmul_bias_act(patches, w_mat, b, act, out_dtype)
    return out.reshape(N, Ho, Wo, cout)


def init_discriminator_params(key, in_channels):
    """Deterministic synthetic params matching the PyTorch module's shapes."""
    cfg = []
    in_f = in_channels
    for out_f in (64, 128, 256, 512):
        cfg += [(in_f, out_f, 1), (out_f, out_f, 1), (out_f, out_f, 2)]
        in_f = out_f
    cfg += [(512, 1, 1)]                        # final conv -> 1 channel
    params = []
    for (cin, cout, stride) in cfg:
        key, k_w, k_b, k_u = jax.random.split(key, 4)
        fan_in = cin * 9
        bound = 1.0 / float(fan_in) ** 0.5
        w = jax.random.uniform(k_w, (cout, cin, 3, 3), jnp.float32, -bound, bound)
        b = jax.random.uniform(k_b, (cout,), jnp.float32, -bound, bound)
        u = jax.random.normal(k_u, (cout,), jnp.float32)
        u = u / (jnp.linalg.norm(u) + 1e-12)
        params.append({"w": w, "b": b, "u": u, "stride": stride})
    return params


def discriminator_forward(img_nchw, params):
    """img_nchw: [N, C, H, W] -> [N, 1, H//16, W//16] (sigmoid patch logits)."""
    x = jnp.transpose(img_nchw, (0, 2, 3, 1)).astype(jnp.bfloat16)  # NCHW -> NHWC
    n_layers = len(params)
    for i, p in enumerate(params):
        last = i == n_layers - 1
        act = "sigmoid" if last else "lrelu"
        out_dtype = jnp.float32 if last else jnp.bfloat16
        x = _conv2d_sn(x, p["w"], p["b"], p["u"], p["stride"], act, out_dtype)
    return jnp.transpose(x, (0, 3, 1, 2))       # NHWC -> NCHW


if __name__ == "__main__":
    key = jax.random.PRNGKey(0)
    k_params, k_img = jax.random.split(key)

    # Small shapes consistent with the module: input_shape = (3, 16, 16),
    # batch = 2 -> output_shape = (1, 1, 1) per sample.
    in_channels, in_h, in_w = 3, 16, 16
    batch = 2

    params = init_discriminator_params(k_params, in_channels)
    img = jax.random.normal(k_img, (batch, in_channels, in_h, in_w), jnp.float32)

    out = discriminator_forward(img, params)
    out = jax.block_until_ready(out)

    expected_shape = (batch, 1, in_h // 16, in_w // 16)
    assert out.shape == expected_shape, (out.shape, expected_shape)
    assert bool(jnp.all(jnp.isfinite(out)))
    assert bool(jnp.all((out >= 0.0) & (out <= 1.0)))   # sigmoid range
    print("KERNEL_OK")
</pallas_src>

<mosaic_0001>
module attributes {stable_mosaic.version = 11 : i64} {
  func.func @_mm_bias_act_kernel(%arg0: i32, %arg1: i32, %arg2: i32, %arg3: memref<512x32xbf16, #tpu.memory_space<vmem>>, %arg4: memref<32x128xbf16, #tpu.memory_space<vmem>>, %arg5: memref<1x128xf32, #tpu.memory_space<vmem>>, %arg6: memref<512x128xbf16, #tpu.memory_space<vmem>>, %arg7: memref<512x128xf32, #tpu.memory_space<vmem>>) attributes {dimension_semantics = [#tpu.dimension_semantics<parallel>, #tpu.dimension_semantics<parallel>, #tpu.dimension_semantics<arbitrary>], iteration_bounds = array<i64: 1, 1, 1>, scalar_prefetch = 0 : i64, scratch_operands = 1 : i64, tpu.core_type = #tpu.core_type<tc>, window_params = [{transform_indices = @transform_0, window_bounds = array<i64: 512, 32>}, {transform_indices = @transform_1, window_bounds = array<i64: 32, 128>}, {transform_indices = @transform_2, window_bounds = array<i64: 1, 128>}, {transform_indices = @transform_3, window_bounds = array<i64: 512, 128>}]} {
    %c0_i32 = arith.constant 0 : i32
    %0 = arith.cmpi eq, %arg2, %c0_i32 : i32
    %1 = arith.extui %0 : i1 to i32
    %c0_i32_0 = arith.constant 0 : i32
    %2 = arith.cmpi ne, %1, %c0_i32_0 : i32
    scf.if %2 {
      %cst_10 = arith.constant 0.000000e+00 : f32
      %12 = vector.broadcast %cst_10 : f32 to vector<512x128xf32>
      %c0_11 = arith.constant 0 : index
      %c0_12 = arith.constant 0 : index
      %13 = vector.load %arg7[%c0_11, %c0_12] : memref<512x128xf32, #tpu.memory_space<vmem>>, vector<512x128xf32>
      tpu.vector_store %arg7[%c0_11, %c0_12], %12 {strides = array<i32>} : memref<512x128xf32, #tpu.memory_space<vmem>>, vector<512x128xf32>,
    } else {
    }
    %c0 = arith.constant 0 : index
    %c0_1 = arith.constant 0 : index
    %3 = vector.load %arg7[%c0, %c0_1] : memref<512x128xf32, #tpu.memory_space<vmem>>, vector<512x128xf32>
    %c0_2 = arith.constant 0 : index
    %c0_3 = arith.constant 0 : index
    %4 = vector.load %arg3[%c0_2, %c0_3] : memref<512x32xbf16, #tpu.memory_space<vmem>>, vector<512x32xbf16>
    %c0_4 = arith.constant 0 : index
    %c0_5 = arith.constant 0 : index
    %5 = vector.load %arg4[%c0_4, %c0_5] : memref<32x128xbf16, #tpu.memory_space<vmem>>, vector<32x128xbf16>
    %cst = arith.constant dense<0.000000e+00> : vector<512x128xf32>
    %6 = tpu.matmul %4, %5, %cst {dimension_numbers = #tpu.dot_dimension_numbers<[1], [0], [0], [1], [0, 0, 1, 1], [], []>} : vector<512x32xbf16>, vector<32x128xbf16>, vector<512x128xf32> -> vector<512x128xf32>
    %7 = arith.addf %3, %6 : vector<512x128xf32>
    %c0_6 = arith.constant 0 : index
    %c0_7 = arith.constant 0 : index
    %8 = vector.load %arg7[%c0_6, %c0_7] : memref<512x128xf32, #tpu.memory_space<vmem>>, vector<512x128xf32>
    tpu.vector_store %arg7[%c0_6, %c0_7], %7 {strides = array<i32>} : memref<512x128xf32, #tpu.memory_space<vmem>>, vector<512x128xf32>,
    %c0_i32_8 = arith.constant 0 : i32
    %9 = arith.cmpi eq, %arg2, %c0_i32_8 : i32
    %10 = arith.extui %9 : i1 to i32
    %c0_i32_9 = arith.constant 0 : i32
    %11 = arith.cmpi ne, %10, %c0_i32_9 : i32
    scf.if %11 {
      %c0_10 = arith.constant 0 : index
      %c0_11 = arith.constant 0 : index
      %12 = vector.load %arg7[%c0_10, %c0_11] : memref<512x128xf32, #tpu.memory_space<vmem>>, vector<512x128xf32>
      %c0_12 = arith.constant 0 : index
      %c0_13 = arith.constant 0 : index
      %13 = vector.load %arg5[%c0_12, %c0_13] : memref<1x128xf32, #tpu.memory_space<vmem>>, vector<1x128xf32>
      %14 = vector.broadcast %13 : vector<1x128xf32> to vector<512x128xf32>
      %15 = arith.addf %12, %14 : vector<512x128xf32>
      %cst_14 = arith.constant 0.000000e+00 : f32
      %16 = vector.broadcast %cst_14 : f32 to vector<512x128xf32>
      %17 = arith.cmpf oge, %15, %16 : vector<512x128xf32>
      %cst_15 = arith.constant 2.000000e-01 : f32
      %18 = vector.broadcast %cst_15 : f32 to vector<512x128xf32>
      %19 = arith.mulf %18, %15 : vector<512x128xf32>
      %20 = arith.select %17, %15, %19 : vector<512x128xi1>, vector<512x128xf32>
      %21 = arith.truncf %20 : vector<512x128xf32> to vector<512x128xbf16>
      %c0_16 = arith.constant 0 : index
      %c0_17 = arith.constant 0 : index
      %22 = vector.load %arg6[%c0_16, %c0_17] : memref<512x128xbf16, #tpu.memory_space<vmem>>, vector<512x128xbf16>
      tpu.vector_store %arg6[%c0_16, %c0_17], %21 {strides = array<i32>} : memref<512x128xbf16, #tpu.memory_space<vmem>>, vector<512x128xbf16>,
    } else {
    }
    return
  }
  func.func @transform_0(%arg0: i32, %arg1: i32, %arg2: i32) -> (i32, i32) {
    %c0_i32 = arith.constant 0 : i32
    return %arg0, %arg2 : i32, i32
  }
  func.func @transform_1(%arg0: i32, %arg1: i32, %arg2: i32) -> (i32, i32) {
    %c0_i32 = arith.constant 0 : i32
    return %arg2, %arg1 : i32, i32
  }
  func.func @transform_2(%arg0: i32, %arg1: i32, %arg2: i32) -> (i32, i32) {
    %c0_i32 = arith.constant 0 : i32
    %c0_i32_0 = arith.constant 0 : i32
    return %c0_i32, %arg1 : i32, i32
  }
  func.func @transform_3(%arg0: i32, %arg1: i32, %arg2: i32) -> (i32, i32) {
    %c0_i32 = arith.constant 0 : i32
    return %arg0, %arg1 : i32, i32
  }
}

</mosaic_0001>

<bundles_post_ra>
// kernel: tpu_custom_call.1
= control target key start
LH: loop header
LB: loop body
LE: loop exit
PB: predicated region body
PF: predicated region fallthrough
CT: control target
= control target key end

     0   :  { %vm388_vm0 = vcmask 261120   ;;  %s2351_s0 = inlined_call_operand.vmem [shape: bf16[512,32], index: 0, kind: input, shape index: {}]   ;;  %s2352_s1 = inlined_call_operand.vmem [shape: bf16[32,128], index: 1, kind: input, shape index: {}]   ;;  %s2353_s2 = inlined_call_operand.vmem [shape: f32[1,128], index: 2, kind: input, shape index: {}]   ;;  %s2354_s3 = inlined_call_operand.hbm [shape: bf16[512,128], index: 3, kind: output, shape index: {}]  }
   0x1   :  { %v2063_v0 = vld [vmem:[%s2352_s1 + $0x8] sm:$0xff]   ;;  %v2064_v1 = vld [vmem:[%s2352_s1] sm:$0xff]   ;;  %v2069_v6 = vld [vmem:[%s2351_s0 + $0x10] sm:$0xff]  }
   0x2   :  { %1988 = vmatprep.subr.bf16.mxu0 %v2063_v0  ;;  %2056 = vmatprep.subr.bf16.mxu1 %v2063_v0  ;;  %v2065_v2 = vld [vmem:[%s2351_s0] sm:$0xff]   ;;  %v2067_v4 = vld [vmem:[%s2351_s0 + $0x8] sm:$0xff]   ;;  %v2070_v7 = vld [vmem:[%s2351_s0 + $0x90] sm:$0xff]  }
   0x3   :  { %1989 = vmatpush3.bf16.msra.mxu0 %v2063_v0  ;;  %2058 = vmatpush3.bf16.msra.mxu1 %v2063_v0  ;;  %v2066_v3 = vld [vmem:[%s2351_s0 + $0x80] sm:$0xff]   ;;  %v2068_v5 = vld [vmem:[%s2351_s0 + $0x88] sm:$0xff]   ;;  %v2071_v8 = vld [vmem:[%s2351_s0 + $0x18] sm:$0xff]  }
   0x4   :  { %1990 = vmatprep.subr.bf16.mxu0 %v2064_v1  ;;  %2057 = vmatprep.subr.bf16.mxu1 %v2064_v1  ;;  %v2072_v9 = vld [vmem:[%s2351_s0 + $0x98] sm:$0xff]   ;;  %v2073_v10 = vld [vmem:[%s2351_s0 + $0x20] sm:$0xff]   ;;  %v2075_v12 = vld [vmem:[%s2351_s0 + $0x28] sm:$0xff]  }
   0x5   :  { %1992 = vmatprep.mubr.msk.bf16.mxu0 %vm388_vm0, %v2065_v2  ;;  %2024 = vmatprep.mubr.msk.bf16.mxu1 %vm388_vm0, %v2066_v3  ;;  %v2074_v11 = vld [vmem:[%s2351_s0 + $0xa0] sm:$0xff]   ;;  %v2076_v13 = vld [vmem:[%s2351_s0 + $0xa8] sm:$0xff]   ;;  %v2077_v14 = vld [vmem:[%s2351_s0 + $0x30] sm:$0xff]  }
   0x6   :  { %v2078_v15 = vld [vmem:[%s2351_s0 + $0xb0] sm:$0xff]   ;;  %v2079_v16 = vld [vmem:[%s2351_s0 + $0x38] sm:$0xff]   ;;  %v2081_v18 = vld [vmem:[%s2351_s0 + $0x40] sm:$0xff]  }
   0x7   :  { %1991 = vmatpush3.bf16.msra.mxu0 %v2064_v1  ;;  %2059 = vmatpush3.bf16.msra.mxu1 %v2064_v1  ;;  %v2080_v17 = vld [vmem:[%s2351_s0 + $0xb8] sm:$0xff]   ;;  %v2082_v19 = vld [vmem:[%s2351_s0 + $0xc0] sm:$0xff]  }
   0xa   :  { %1993 = vmatmul.mubr.msk.bf16.vlgmr.msra.gmra.mxu0 %vm388_vm0, %v2067_v4  ;;  %2025 = vmatmul.mubr.msk.bf16.vlgmr.msra.gmra.mxu1 %vm388_vm0, %v2068_v5 }
   0xb   :  { %1996 = vmatprep.mubr.msk.bf16.mxu0 %vm388_vm0, %v2069_v6  ;;  %2028 = vmatprep.mubr.msk.bf16.mxu1 %vm388_vm0, %v2070_v7 }
  0x12   :  { %1997 = vmatmul.mubr.msk.bf16.gmra.mxu0 %vm388_vm0, %v2071_v8  ;;  %2029 = vmatmul.mubr.msk.bf16.gmra.mxu1 %vm388_vm0, %v2072_v9 }
  0x13   :  { %2000 = vmatprep.mubr.msk.bf16.mxu0 %vm388_vm0, %v2073_v10  ;;  %2032 = vmatprep.mubr.msk.bf16.mxu1 %vm388_vm0, %v2074_v11 }
  0x1a   :  { %2001 = vmatmul.mubr.msk.bf16.gmra.mxu0 %vm388_vm0, %v2075_v12  ;;  %2033 = vmatmul.mubr.msk.bf16.gmra.mxu1 %vm388_vm0, %v2076_v13 }
  0x1b   :  { %2004 = vmatprep.mubr.msk.bf16.mxu0 %vm388_vm0, %v2077_v14  ;;  %2036 = vmatprep.mubr.msk.bf16.mxu1 %vm388_vm0, %v2078_v15 }
  0x22   :  { %2005 = vmatmul.mubr.msk.bf16.gmra.mxu0 %vm388_vm0, %v2079_v16  ;;  %2037 = vmatmul.mubr.msk.bf16.gmra.mxu1 %vm388_vm0, %v2080_v17 }
  0x23   :  { %8 = vsyncpa [#allocation4], 0  ;;  %2008 = vmatprep.mubr.msk.bf16.mxu0 %vm388_vm0, %v2081_v18  ;;  %2040 = vmatprep.mubr.msk.bf16.mxu1 %vm388_vm0, %v2082_v19  ;;  %v2083_v20 = vld [vmem:[%s2351_s0 + $0x48] sm:$0xff]   ;;  %v2085_v22 = vld [vmem:[%s2351_s0 + $0x50] sm:$0xff]  }
  0x24   :  { %v2084_v21 = vld [vmem:[%s2351_s0 + $0xc8] sm:$0xff]   ;;  %v2086_v23 = vld [vmem:[%s2351_s0 + $0xd0] sm:$0xff]   ;;  %v2087_v24 = vld [vmem:[%s2351_s0 + $0x58] sm:$0xff]  }
  0x25   :  { %v2088_v25 = vld [vmem:[%s2351_s0 + $0xd8] sm:$0xff]   ;;  %v2089_v26 = vld [vmem:[%s2351_s0 + $0x60] sm:$0xff]   ;;  %v2091_v28 = vld [vmem:[%s2351_s0 + $0x68] sm:$0xff]  }
  0x26   :  { %v2090_v27 = vld [vmem:[%s2351_s0 + $0xe0] sm:$0xff]   ;;  %v2092_v29 = vld [vmem:[%s2351_s0 + $0xe8] sm:$0xff]   ;;  %v2093_v30 = vld [vmem:[%s2351_s0 + $0x70] sm:$0xff]  }
  0x27   :  { %v2094_v31 = vld [vmem:[%s2351_s0 + $0xf0] sm:$0xff]   ;;  %v2095_v32 = vld [vmem:[%s2351_s0 + $0x78] sm:$0xff]   ;;  %v2279_v34 = vld [vmem:[%s2353_s2] ss:$0 sm:$0xff] }
  0x28   :  { %v2096_v33 = vld [vmem:[%s2351_s0 + $0xf8] sm:$0xff]   ;;  %s2119_s0 = smov [#allocation3]  }
  0x29   :  { %s1557_s2 = sshll.u32 %s2119_s0, 4  ;;  %s1558_s2 = int_to_ptr.vmem [resolvable:$true] %s1557_s2 }
  0x2a   :  { %2009 = vmatmul.mubr.msk.bf16.gmra.mxu0 %vm388_vm0, %v2083_v20  ;;  %2041 = vmatmul.mubr.msk.bf16.gmra.mxu1 %vm388_vm0, %v2084_v21  ;;  %s2097_s25 = scalar_lea.vmem %s1558_s2, 4096  ;;  %p2102_p1 = scmp.lt.s32.totalorder %s1558_s2, %s1558_s2 }
  0x2b   :  { %2012 = vmatprep.mubr.msk.bf16.mxu0 %vm388_vm0, %v2085_v22  ;;  %2044 = vmatprep.mubr.msk.bf16.mxu1 %vm388_vm0, %v2086_v23  ;;  %p2098_p0 = scmp.ne.s32.totalorder %s1558_s2, %s2097_s25  ;;  %p2103_p2 = scmp.lt.s32.totalorder %s2097_s25, %s2097_s25 }
  0x2d   :  { %p2104_p3 = por %p2103_p2, %p2102_p1 }
  0x2f   :  { %p2105_p4 = pnand %p2104_p3, %p2098_p0 }
  0x32   :  { %2013 = vmatmul.mubr.msk.bf16.gmra.mxu0 %vm388_vm0, %v2087_v24  ;;  %2045 = vmatmul.mubr.msk.bf16.gmra.mxu1 %vm388_vm0, %v2088_v25 }
  0x33   :  { %2016 = vmatprep.mubr.msk.bf16.mxu0 %vm388_vm0, %v2089_v26  ;;  %2048 = vmatprep.mubr.msk.bf16.mxu1 %vm388_vm0, %v2090_v27 }
  0x3a   :  { %2017 = vmatmul.mubr.msk.bf16.gmra.mxu0 %vm388_vm0, %v2091_v28  ;;  %2049 = vmatmul.mubr.msk.bf16.gmra.mxu1 %vm388_vm0, %v2092_v29 }
  0x3b   :  { %2020 = vmatprep.mubr.msk.bf16.mxu0 %vm388_vm0, %v2093_v30  ;;  %2052 = vmatprep.mubr.msk.bf16.mxu1 %vm388_vm0, %v2094_v31 }
  0x42   :  { %2021 = vmatmul.mubr.msk.bf16.gmra.mxu0 %vm388_vm0, %v2095_v32  ;;  %2053 = vmatmul.mubr.msk.bf16.gmra.mxu1 %vm388_vm0, %v2096_v33 }
  0xca   :  { %v1994_v35 = vpop.f32.mrf.mxu0  ;;  %v2026_v36 = vpop.f32.mrf.mxu1 }
  0xcb   :  { %v978_v37 = vadd.f32 %v1994_v35, %v2279_v34  ;;  %v1010_v38 = vadd.f32 %v2026_v36, %v2279_v34 }
  0xcc   :  { %v519_v39 = vpop.f32.mrf.mxu0  ;;  %v647_v40 = vpop.f32.mrf.mxu1 }
  0xcd   :  { %vm1042_vm1 = vcmp.ge.f32.partialorder %v978_v37, 0.0  ;;  %v1106_v41 = vmul.f32 0.2, %v978_v37  ;;  %vm1074_vm2 = vcmp.ge.f32.partialorder %v1010_v38, 0.0  ;;  %v1138_v42 = vmul.f32 0.2, %v1010_v38 }
  0xce   :  { %v976_v43 = vadd.f32 %v2279_v34, %v519_v39  ;;  %v1008_v44 = vadd.f32 %v2279_v34, %v647_v40  ;;  %v1995_v45 = vpop.f32.mrf.mxu0  ;;  %v2027_v46 = vpop.f32.mrf.mxu1 }
  0xcf   :  { %v1170_v47 = vsel %vm1042_vm1, %v978_v37, %v1106_v41  ;;  %v979_v48 = vadd.f32 %v1995_v45, %v2279_v34  ;;  %v1011_v49 = vadd.f32 %v2027_v46, %v2279_v34  ;;  %v1202_v50 = vsel %vm1074_vm2, %v1010_v38, %v1138_v42 }
  0xd0   :  { %vm1040_vm3 = vcmp.ge.f32.partialorder %v976_v43, 0.0  ;;  %v1104_v51 = vmul.f32 0.2, %v976_v43  ;;  %vm1072_vm4 = vcmp.ge.f32.partialorder %v1008_v44, 0.0  ;;  %v522_v52 = vpop.f32.mrf.mxu0  ;;  %v650_v53 = vpop.f32.mrf.mxu1  ;;  %v1136_v57 = vmul.f32 0.2, %v1008_v44 }
  0xd1   :  { %vm1043_vm5 = vcmp.ge.f32.partialorder %v979_v48, 0.0  ;;  %v1107_v54 = vmul.f32 0.2, %v979_v48  ;;  %vm1075_vm6 = vcmp.ge.f32.partialorder %v1011_v49, 0.0  ;;  %v1139_v55 = vmul.f32 0.2, %v1011_v49 }
  0xd2   :  { %v1168_v56 = vsel %vm1040_vm3, %v976_v43, %v1104_v51  ;;  %v977_v58 = vadd.f32 %v2279_v34, %v522_v52  ;;  %v1009_v59 = vadd.f32 %v2279_v34, %v650_v53  ;;  %v1998_v60 = vpop.f32.mrf.mxu0  ;;  %v2030_v61 = vpop.f32.mrf.mxu1  ;;  %v1200_v9 = vsel %vm1072_vm4, %v1008_v44, %v1136_v57 }
  0xd3   :  { %v1171_v62 = vsel %vm1043_vm5, %v979_v48, %v1107_v54  ;;  %v1203_v63 = vsel %vm1075_vm6, %v1011_v49, %v1139_v55  ;;  %v982_v0 = vadd.f32 %v1998_v60, %v2279_v34  ;;  %v1014_v1 = vadd.f32 %v2030_v61, %v2279_v34 }
  0xd4   :  { %v1771_v2 = vpack.c.bf16 %v1171_v62, %v1170_v47  ;;  %v1851_v3 = vpack.c.bf16 %v1203_v63, %v1202_v50  ;;  %vm1041_vm7 = vcmp.ge.f32.partialorder %v977_v58, 0.0  ;;  %v1105_v4 = vmul.f32 0.2, %v977_v58  ;;  %v535_v5 = vpop.f32.mrf.mxu0  ;;  %v663_v6 = vpop.f32.mrf.mxu1 }
  0xd5   :  { %vm1073_vm8 = vcmp.ge.f32.partialorder %v1009_v59, 0.0  ;;  %v1137_v7 = vmul.f32 0.2, %v1009_v59  ;;  %vm1046_vm9 = vcmp.ge.f32.partialorder %v982_v0, 0.0  ;;  %v1110_v8 = vmul.f32 0.2, %v982_v0 }
  0xd6   :  { %1923 = vst [vmem:[#allocation3 + $0x8] sm:$0xff] %v1771_v2   ;;  %1939 = vst [vmem:[#allocation3 + $0x88] sm:$0xff] %v1851_v3   ;;  %v1169_v10 = vsel %vm1041_vm7, %v977_v58, %v1105_v4  ;;  %v1142_v11 = vmul.f32 0.2, %v1014_v1  ;;  %v980_v12 = vadd.f32 %v2279_v34, %v535_v5  ;;  %v1999_v13 = vpop.f32.mrf.mxu0  ;;  %v2031_v14 = vpop.f32.mrf.mxu1  ;;  %vm1078_vm10 = vcmp.ge.f32.partialorder %v1014_v1, 0.0 }
  0xd7   :  { %v1766_v15 = vpack.c.bf16 %v1169_v10, %v1168_v56  ;;  %v1201_v16 = vsel %vm1073_vm8, %v1009_v59, %v1137_v7  ;;  %v1012_v17 = vadd.f32 %v2279_v34, %v663_v6  ;;  %v1174_v19 = vsel %vm1046_vm9, %v982_v0, %v1110_v8 }
  0xd8   :  { %v1846_v18 = vpack.c.bf16 %v1201_v16, %v1200_v9  ;;  %vm1044_vm11 = vcmp.ge.f32.partialorder %v980_v12, 0.0  ;;  %v1108_v20 = vmul.f32 0.2, %v980_v12  ;;  %v538_v21 = vpop.f32.mrf.mxu0  ;;  %v666_v22 = vpop.f32.mrf.mxu1  ;;  %v983_v24 = vadd.f32 %v1999_v13, %v2279_v34 }
  0xd9   :  { %1767 = vst [vmem:[#allocation3] sm:$0xff] %v1766_v15   ;;  %vm1076_vm12 = vcmp.ge.f32.partialorder %v1012_v17, 0.0  ;;  %v1140_v23 = vmul.f32 0.2, %v1012_v17  ;;  %v1015_v25 = vadd.f32 %v2031_v14, %v2279_v34  ;;  %v1206_v26 = vsel %vm1078_vm10, %v1014_v1, %v1142_v11 }
  0xda   :  { %1938 = vst [vmem:[#allocation3 + $0x80] sm:$0xff] %v1846_v18   ;;  %v1172_v27 = vsel %vm1044_vm11, %v980_v12, %v1108_v20  ;;  %v981_v28 = vadd.f32 %v2279_v34, %v538_v21  ;;  %v1013_v29 = vadd.f32 %v2279_v34, %v666_v22  ;;  %v2002_v30 = vpop.f32.mrf.mxu0  ;;  %v2034_v31 = vpop.f32.mrf.mxu1  ;;  %vm1047_vm13 = vcmp.ge.f32.partialorder %v983_v24, 0.0 }
  0xdb   :  { %v1204_v32 = vsel %vm1076_vm12, %v1012_v17, %v1140_v23  ;;  %v1111_v33 = vmul.f32 0.2, %v983_v24  ;;  %vm1079_vm14 = vcmp.ge.f32.partialorder %v1015_v25, 0.0  ;;  %v1143_v35 = vmul.f32 0.2, %v1015_v25 }
  0xdc   :  { %vm1045_vm15 = vcmp.ge.f32.partialorder %v981_v28, 0.0  ;;  %v1109_v36 = vmul.f32 0.2, %v981_v28  ;;  %vm1077_vm0 = vcmp.ge.f32.partialorder %v1013_v29, 0.0  ;;  %v551_v37 = vpop.f32.mrf.mxu0  ;;  %v679_v38 = vpop.f32.mrf.mxu1  ;;  %v1141_v40 = vmul.f32 0.2, %v1013_v29 }
  0xdd   :  { %v1175_v39 = vsel %vm1047_vm13, %v983_v24, %v1111_v33  ;;  %v986_v41 = vadd.f32 %v2002_v30, %v2279_v34  ;;  %v1018_v42 = vadd.f32 %v2034_v31, %v2279_v34  ;;  %v1207_v44 = vsel %vm1079_vm14, %v1015_v25, %v1143_v35 }
  0xde   :  { %v1781_v43 = vpack.c.bf16 %v1175_v39, %v1174_v19  ;;  %v1173_v45 = vsel %vm1045_vm15, %v981_v28, %v1109_v36  ;;  %v984_v46 = vadd.f32 %v2279_v34, %v551_v37  ;;  %v2003_v47 = vpop.f32.mrf.mxu0  ;;  %v2035_v48 = vpop.f32.mrf.mxu1  ;;  %v1861_v49 = vpack.c.bf16 %v1207_v44, %v1206_v26 }
  0xdf   :  { %v1776_v50 = vpack.c.bf16 %v1173_v45, %v1172_v27  ;;  %v1205_v51 = vsel %vm1077_vm0, %v1013_v29, %v1141_v40  ;;  %vm1050_vm1 = vcmp.ge.f32.partialorder %v986_v41, 0.0  ;;  %v1114_v53 = vmul.f32 0.2, %v986_v41 }
  0xe0   :  { %1925 = vst [vmem:[#allocation3 + $0x18] sm:$0xff] %v1781_v43   ;;  %v1856_v52 = vpack.c.bf16 %v1205_v51, %v1204_v32  ;;  %vm1082_vm2 = vcmp.ge.f32.partialorder %v1018_v42, 0.0  ;;  %v1146_v54 = vmul.f32 0.2, %v1018_v42  ;;  %v554_v55 = vpop.f32.mrf.mxu0  ;;  %v682_v56 = vpop.f32.mrf.mxu1  ;;  %1941 = vst [vmem:[#allocation3 + $0x98] sm:$0xff] %v1861_v49   ;;  %vm1048_vm3 = vcmp.ge.f32.partialorder %v984_v46, 0.0 }
  0xe1   :  { %1924 = vst [vmem:[#allocation3 + $0x10] sm:$0xff] %v1776_v50   ;;  %v1112_v57 = vmul.f32 0.2, %v984_v46  ;;  %v1016_v58 = vadd.f32 %v2279_v34, %v679_v38  ;;  %v987_v59 = vadd.f32 %v2003_v47, %v2279_v34  ;;  %v1178_v60 = vsel %vm1050_vm1, %v986_v41, %v1114_v53 }
  0xe2   :  { %1940 = vst [vmem:[#allocation3 + $0x90] sm:$0xff] %v1856_v52   ;;  %v1210_v61 = vsel %vm1082_vm2, %v1018_v42, %v1146_v54  ;;  %v1019_v62 = vadd.f32 %v2035_v48, %v2279_v34  ;;  %v985_v63 = vadd.f32 %v2279_v34, %v554_v55  ;;  %v2006_v0 = vpop.f32.mrf.mxu0  ;;  %v2038_v1 = vpop.f32.mrf.mxu1  ;;  %v1017_v10 = vadd.f32 %v2279_v34, %v682_v56 }
  0xe3   :  { %v1176_v2 = vsel %vm1048_vm3, %v984_v46, %v1112_v57  ;;  %vm1080_vm4 = vcmp.ge.f32.partialorder %v1016_v58, 0.0  ;;  %v1144_v3 = vmul.f32 0.2, %v1016_v58  ;;  %vm1051_vm5 = vcmp.ge.f32.partialorder %v987_v59, 0.0 }
  0xe4   :  { %v1115_v4 = vmul.f32 0.2, %v987_v59  ;;  %vm1083_vm6 = vcmp.ge.f32.partialorder %v1019_v62, 0.0  ;;  %v1147_v5 = vmul.f32 0.2, %v1019_v62  ;;  %vm1049_vm7 = vcmp.ge.f32.partialorder %v985_v63, 0.0  ;;  %v567_v6 = vpop.f32.mrf.mxu0  ;;  %v695_v7 = vpop.f32.mrf.mxu1 }
  0xe5   :  { %v1208_v8 = vsel %vm1080_vm4, %v1016_v58, %v1144_v3  ;;  %v1113_v9 = vmul.f32 0.2, %v985_v63  ;;  %v990_v11 = vadd.f32 %v2006_v0, %v2279_v34  ;;  %v1022_v14 = vadd.f32 %v2038_v1, %v2279_v34 }
  0xe6   :  { %v1179_v12 = vsel %vm1051_vm5, %v987_v59, %v1115_v4  ;;  %v1211_v13 = vsel %vm1083_vm6, %v1019_v62, %v1147_v5  ;;  %v988_v15 = vadd.f32 %v2279_v34, %v567_v6  ;;  %v2007_v16 = vpop.f32.mrf.mxu0  ;;  %v2039_v17 = vpop.f32.mrf.mxu1  ;;  %vm1081_vm8 = vcmp.ge.f32.partialorder %v1017_v10, 0.0 }
  0xe7   :  { %v1791_v18 = vpack.c.bf16 %v1179_v12, %v1178_v60  ;;  %v1871_v19 = vpack.c.bf16 %v1211_v13, %v1210_v61  ;;  %v1177_v20 = vsel %vm1049_vm7, %v985_v63, %v1113_v9  ;;  %v1145_v22 = vmul.f32 0.2, %v1017_v10 }
  0xe8   :  { %v1786_v21 = vpack.c.bf16 %v1177_v20, %v1176_v2  ;;  %vm1054_vm9 = vcmp.ge.f32.partialorder %v990_v11, 0.0  ;;  %v1118_v23 = vmul.f32 0.2, %v990_v11  ;;  %v570_v24 = vpop.f32.mrf.mxu0  ;;  %v698_v25 = vpop.f32.mrf.mxu1  ;;  %vm1086_vm10 = vcmp.ge.f32.partialorder %v1022_v14, 0.0 }
  0xe9   :  { %1927 = vst [vmem:[#allocation3 + $0x28] sm:$0xff] %v1791_v18   ;;  %1943 = vst [vmem:[#allocation3 + $0xa8] sm:$0xff] %v1871_v19   ;;  %v1150_v26 = vmul.f32 0.2, %v1022_v14  ;;  %vm1052_vm11 = vcmp.ge.f32.partialorder %v988_v15, 0.0  ;;  %v1209_v28 = vsel %vm1081_vm8, %v1017_v10, %v1145_v22  ;;  %v1020_v30 = vadd.f32 %v2279_v34, %v695_v7 }
  0xea   :  { %v1116_v27 = vmul.f32 0.2, %v988_v15  ;;  %1926 = vst [vmem:[#allocation3 + $0x20] sm:$0xff] %v1786_v21   ;;  %v1182_v29 = vsel %vm1054_vm9, %v990_v11, %v1118_v23  ;;  %v991_v31 = vadd.f32 %v2007_v16, %v2279_v34  ;;  %v2010_v32 = vpop.f32.mrf.mxu0  ;;  %v2042_v33 = vpop.f32.mrf.mxu1  ;;  %v1866_v35 = vpack.c.bf16 %v1209_v28, %v1208_v8 }
  0xeb   :  { %v1214_v36 = vsel %vm1086_vm10, %v1022_v14, %v1150_v26  ;;  %v1023_v38 = vadd.f32 %v2039_v17, %v2279_v34  ;;  %vm1084_vm12 = vcmp.ge.f32.partialorder %v1020_v30, 0.0  ;;  %v1148_v39 = vmul.f32 0.2, %v1020_v30 }
  0xec   :  { %v1180_v37 = vsel %vm1052_vm11, %v988_v15, %v1116_v27  ;;  %vm1055_vm13 = vcmp.ge.f32.partialorder %v991_v31, 0.0  ;;  %v1119_v40 = vmul.f32 0.2, %v991_v31  ;;  %v583_v41 = vpop.f32.mrf.mxu0  ;;  %v711_v42 = vpop.f32.mrf.mxu1  ;;  %1942 = vst [vmem:[#allocation3 + $0xa0] sm:$0xff] %v1866_v35   ;;  %v989_v44 = vadd.f32 %v2279_v34, %v570_v24 }
  0xed   :  { %vm1087_vm14 = vcmp.ge.f32.partialorder %v1023_v38, 0.0  ;;  %v1151_v43 = vmul.f32 0.2, %v1023_v38  ;;  %v1021_v45 = vadd.f32 %v2279_v34, %v698_v25  ;;  %v1212_v46 = vsel %vm1084_vm12, %v1020_v30, %v1148_v39 }
  0xee   :  { %v1183_v47 = vsel %vm1055_vm13, %v991_v31, %v1119_v40  ;;  %v994_v48 = vadd.f32 %v2010_v32, %v2279_v34  ;;  %v1026_v49 = vadd.f32 %v2042_v33, %v2279_v34  ;;  %v2011_v50 = vpop.f32.mrf.mxu0  ;;  %v2043_v51 = vpop.f32.mrf.mxu1  ;;  %vm1053_vm15 = vcmp.ge.f32.partialorder %v989_v44, 0.0 }
  0xef   :  { %v1801_v52 = vpack.c.bf16 %v1183_v47, %v1182_v29  ;;  %v1215_v53 = vsel %vm1087_vm14, %v1023_v38, %v1151_v43  ;;  %v1117_v54 = vmul.f32 0.2, %v989_v44  ;;  %vm1085_vm0 = vcmp.ge.f32.partialorder %v1021_v45, 0.0 }
  0xf0   :  { %v1881_v55 = vpack.c.bf16 %v1215_v53, %v1214_v36  ;;  %v1149_v56 = vmul.f32 0.2, %v1021_v45  ;;  %vm1058_vm1 = vcmp.ge.f32.partialorder %v994_v48, 0.0  ;;  %v586_v57 = vpop.f32.mrf.mxu0  ;;  %v714_v58 = vpop.f32.mrf.mxu1  ;;  %v1122_v60 = vmul.f32 0.2, %v994_v48 }
  0xf1   :  { %1929 = vst [vmem:[#allocation3 + $0x38] sm:$0xff] %v1801_v52   ;;  %v1181_v59 = vsel %vm1053_vm15, %v989_v44, %v1117_v54  ;;  %vm1090_vm2 = vcmp.ge.f32.partialorder %v1026_v49, 0.0  ;;  %v1154_v61 = vmul.f32 0.2, %v1026_v49  ;;  %v992_v0 = vadd.f32 %v2279_v34, %v583_v41 }
  0xf2   :  { %1945 = vst [vmem:[#allocation3 + $0xb8] sm:$0xff] %v1881_v55   ;;  %v1796_v62 = vpack.c.bf16 %v1181_v59, %v1180_v37  ;;  %v1213_v63 = vsel %vm1085_vm0, %v1021_v45, %v1149_v56  ;;  %v1024_v1 = vadd.f32 %v2279_v34, %v711_v42  ;;  %v2014_v2 = vpop.f32.mrf.mxu0  ;;  %v2046_v3 = vpop.f32.mrf.mxu1  ;;  %v1186_v5 = vsel %vm1058_vm1, %v994_v48, %v1122_v60 }
  0xf3   :  { %v1876_v4 = vpack.c.bf16 %v1213_v63, %v1212_v46  ;;  %v1218_v6 = vsel %vm1090_vm2, %v1026_v49, %v1154_v61  ;;  %v995_v7 = vadd.f32 %v2011_v50, %v2279_v34  ;;  %vm1056_vm3 = vcmp.ge.f32.partialorder %v992_v0, 0.0 }
  0xf4   :  { %1928 = vst [vmem:[#allocation3 + $0x30] sm:$0xff] %v1796_v62   ;;  %v1120_v8 = vmul.f32 0.2, %v992_v0  ;;  %vm1088_vm4 = vcmp.ge.f32.partialorder %v1024_v1, 0.0  ;;  %v1152_v9 = vmul.f32 0.2, %v1024_v1  ;;  %v599_v10 = vpop.f32.mrf.mxu0  ;;  %v727_v11 = vpop.f32.mrf.mxu1  ;;  %v1027_v13 = vadd.f32 %v2043_v51, %v2279_v34 }
  0xf5   :  { %1944 = vst [vmem:[#allocation3 + $0xb0] sm:$0xff] %v1876_v4   ;;  %vm1059_vm5 = vcmp.ge.f32.partialorder %v995_v7, 0.0  ;;  %v1123_v12 = vmul.f32 0.2, %v995_v7  ;;  %v993_v14 = vadd.f32 %v2279_v34, %v586_v57  ;;  %v1025_v17 = vadd.f32 %v2279_v34, %v714_v58 }
  0xf6   :  { %v1184_v15 = vsel %vm1056_vm3, %v992_v0, %v1120_v8  ;;  %v1216_v16 = vsel %vm1088_vm4, %v1024_v1, %v1152_v9  ;;  %v998_v18 = vadd.f32 %v2014_v2, %v2279_v34  ;;  %v2015_v19 = vpop.f32.mrf.mxu0  ;;  %v2047_v20 = vpop.f32.mrf.mxu1  ;;  %vm1091_vm6 = vcmp.ge.f32.partialorder %v1027_v13, 0.0 }
  0xf7   :  { %v1187_v21 = vsel %vm1059_vm5, %v995_v7, %v1123_v12  ;;  %v1155_v22 = vmul.f32 0.2, %v1027_v13  ;;  %vm1057_vm7 = vcmp.ge.f32.partialorder %v993_v14, 0.0  ;;  %v1121_v24 = vmul.f32 0.2, %v993_v14 }
  0xf8   :  { %v1811_v23 = vpack.c.bf16 %v1187_v21, %v1186_v5  ;;  %vm1089_vm8 = vcmp.ge.f32.partialorder %v1025_v17, 0.0  ;;  %v1153_v25 = vmul.f32 0.2, %v1025_v17  ;;  %v602_v26 = vpop.f32.mrf.mxu0  ;;  %v730_v27 = vpop.f32.mrf.mxu1  ;;  %vm1062_vm9 = vcmp.ge.f32.partialorder %v998_v18, 0.0 }
  0xf9   :  { %v1219_v28 = vsel %vm1091_vm6, %v1027_v13, %v1155_v22  ;;  %v1126_v29 = vmul.f32 0.2, %v998_v18  ;;  %v1030_v30 = vadd.f32 %v2046_v3, %v2279_v34  ;;  %v1185_v32 = vsel %vm1057_vm7, %v993_v14, %v1121_v24 }
  0xfa   :  { %1931 = vst [vmem:[#allocation3 + $0x48] sm:$0xff] %v1811_v23   ;;  %v1891_v31 = vpack.c.bf16 %v1219_v28, %v1218_v6  ;;  %v1217_v33 = vsel %vm1089_vm8, %v1025_v17, %v1153_v25  ;;  %v996_v35 = vadd.f32 %v2279_v34, %v599_v10  ;;  %v2018_v36 = vpop.f32.mrf.mxu0  ;;  %v2050_v37 = vpop.f32.mrf.mxu1  ;;  %v1806_v38 = vpack.c.bf16 %v1185_v32, %v1184_v15 }
  0xfb   :  { %v1886_v39 = vpack.c.bf16 %v1217_v33, %v1216_v16  ;;  %v1190_v40 = vsel %vm1062_vm9, %v998_v18, %v1126_v29  ;;  %vm1094_vm10 = vcmp.ge.f32.partialorder %v1030_v30, 0.0  ;;  %v1158_v41 = vmul.f32 0.2, %v1030_v30 }
  0xfc   :  { %1947 = vst [vmem:[#allocation3 + $0xc8] sm:$0xff] %v1891_v31   ;;  %vm1060_vm11 = vcmp.ge.f32.partialorder %v996_v35, 0.0  ;;  %v1124_v42 = vmul.f32 0.2, %v996_v35  ;;  %v1028_v43 = vadd.f32 %v2279_v34, %v727_v11  ;;  %v615_v44 = vpop.f32.mrf.mxu0  ;;  %v743_v45 = vpop.f32.mrf.mxu1  ;;  %1930 = vst [vmem:[#allocation3 + $0x40] sm:$0xff] %v1806_v38   ;;  %v999_v46 = vadd.f32 %v2015_v19, %v2279_v34 }
  0xfd   :  { %1946 = vst [vmem:[#allocation3 + $0xc0] sm:$0xff] %v1886_v39   ;;  %v1031_v47 = vadd.f32 %v2047_v20, %v2279_v34  ;;  %v997_v48 = vadd.f32 %v2279_v34, %v602_v26  ;;  %v1029_v49 = vadd.f32 %v2279_v34, %v730_v27  ;;  %v1222_v50 = vsel %vm1094_vm10, %v1030_v30, %v1158_v41 }
  0xfe   :  { %v1188_v51 = vsel %vm1060_vm11, %v996_v35, %v1124_v42  ;;  %vm1092_vm12 = vcmp.ge.f32.partialorder %v1028_v43, 0.0  ;;  %v1156_v52 = vmul.f32 0.2, %v1028_v43  ;;  %v2019_v53 = vpop.f32.mrf.mxu0  ;;  %v2051_v54 = vpop.f32.mrf.mxu1  ;;  %vm1063_vm13 = vcmp.ge.f32.partialorder %v999_v46, 0.0 }
  0xff   :  { %v1127_v55 = vmul.f32 0.2, %v999_v46  ;;  %vm1095_vm14 = vcmp.ge.f32.partialorder %v1031_v47, 0.0  ;;  %v1159_v56 = vmul.f32 0.2, %v1031_v47  ;;  %vm1061_vm15 = vcmp.ge.f32.partialorder %v997_v48, 0.0 }
 0x100   :  { %v1220_v57 = vsel %vm1092_vm12, %v1028_v43, %v1156_v52  ;;  %v1125_v58 = vmul.f32 0.2, %v997_v48  ;;  %vm1093_vm0 = vcmp.ge.f32.partialorder %v1029_v49, 0.0  ;;  %v618_v59 = vpop.f32.mrf.mxu0  ;;  %v746_v60 = vpop.f32.mrf.mxu1  ;;  %v1157_v63 = vmul.f32 0.2, %v1029_v49 }
 0x101   :  { %v1191_v61 = vsel %vm1063_vm13, %v999_v46, %v1127_v55  ;;  %v1223_v62 = vsel %vm1095_vm14, %v1031_v47, %v1159_v56  ;;  %v1002_v0 = vadd.f32 %v2018_v36, %v2279_v34  ;;  %v1034_v4 = vadd.f32 %v2050_v37, %v2279_v34 }
 0x102   :  { %v1821_v1 = vpack.c.bf16 %v1191_v61, %v1190_v40  ;;  %v1901_v2 = vpack.c.bf16 %v1223_v62, %v1222_v50  ;;  %v1189_v3 = vsel %vm1061_vm15, %v997_v48, %v1125_v58  ;;  %v2022_v5 = vpop.f32.mrf.mxu0  ;;  %v2054_v6 = vpop.f32.mrf.mxu1  ;;  %v1221_v8 = vsel %vm1093_vm0, %v1029_v49, %v1157_v63 }
 0x103   :  { %v1816_v7 = vpack.c.bf16 %v1189_v3, %v1188_v51  ;;  %vm1066_vm1 = vcmp.ge.f32.partialorder %v1002_v0, 0.0  ;;  %v1130_v9 = vmul.f32 0.2, %v1002_v0  ;;  %v1896_v10 = vpack.c.bf16 %v1221_v8, %v1220_v57 }
 0x104   :  { %1933 = vst [vmem:[#allocation3 + $0x58] sm:$0xff] %v1821_v1   ;;  %1949 = vst [vmem:[#allocation3 + $0xd8] sm:$0xff] %v1901_v2   ;;  %vm1098_vm2 = vcmp.ge.f32.partialorder %v1034_v4, 0.0  ;;  %v1162_v11 = vmul.f32 0.2, %v1034_v4  ;;  %v1000_v12 = vadd.f32 %v2279_v34, %v615_v44  ;;  %v1032_v13 = vadd.f32 %v2279_v34, %v743_v45  ;;  %v631_v19 = vpop.f32.mrf.mxu0  ;;  %v759_v20 = vpop.f32.mrf.mxu1 }
 0x105   :  { %1932 = vst [vmem:[#allocation3 + $0x50] sm:$0xff] %v1816_v7   ;;  %v1003_v14 = vadd.f32 %v2019_v53, %v2279_v34  ;;  %v1035_v15 = vadd.f32 %v2051_v54, %v2279_v34  ;;  %1948 = vst [vmem:[#allocation3 + $0xd0] sm:$0xff] %v1896_v10   ;;  %v1194_v16 = vsel %vm1066_vm1, %v1002_v0, %v1130_v9 }
 0x106   :  { %vm1064_vm3 = vcmp.ge.f32.partialorder %v1000_v12, 0.0  ;;  %v1128_v17 = vmul.f32 0.2, %v1000_v12  ;;  %v1001_v18 = vadd.f32 %v2279_v34, %v618_v59  ;;  %v1226_v21 = vsel %vm1098_vm2, %v1034_v4, %v1162_v11  ;;  %v2023_v33 = vpop.f32.mrf.mxu0  ;;  %v2055_v35 = vpop.f32.mrf.mxu1 }
 0x107   :  { %vm1096_vm4 = vcmp.ge.f32.partialorder %v1032_v13, 0.0  ;;  %vm1067_vm5 = vcmp.ge.f32.partialorder %v1003_v14, 0.0  ;;  %v1131_v22 = vmul.f32 0.2, %v1003_v14  ;;  %v1160_v23 = vmul.f32 0.2, %v1032_v13 }
 0x108   :  { %vm1099_vm6 = vcmp.ge.f32.partialorder %v1035_v15, 0.0  ;;  %v1163_v24 = vmul.f32 0.2, %v1035_v15  ;;  %vm1065_vm7 = vcmp.ge.f32.partialorder %v1001_v18, 0.0  ;;  %v1192_v25 = vsel %vm1064_vm3, %v1000_v12, %v1128_v17  ;;  %v634_v49 = vpop.f32.mrf.mxu0  ;;  %v762_v50 = vpop.f32.mrf.mxu1 }
 0x109   :  { %v1195_v26 = vsel %vm1067_vm5, %v1003_v14, %v1131_v22  ;;  %v1129_v27 = vmul.f32 0.2, %v1001_v18  ;;  %v1033_v28 = vadd.f32 %v2279_v34, %v746_v60  ;;  %v1006_v31 = vadd.f32 %v2022_v5, %v2279_v34 }
 0x10a   :  { %v1831_v29 = vpack.c.bf16 %v1195_v26, %v1194_v16  ;;  %v1227_v30 = vsel %vm1099_vm6, %v1035_v15, %v1163_v24  ;;  %v1038_v32 = vadd.f32 %v2054_v6, %v2279_v34  ;;  %v1224_v39 = vsel %vm1096_vm4, %v1032_v13, %v1160_v23 }
 0x10b   :  { %v1911_v36 = vpack.c.bf16 %v1227_v30, %v1226_v21  ;;  %v1193_v37 = vsel %vm1065_vm7, %v1001_v18, %v1129_v27  ;;  %vm1097_vm8 = vcmp.ge.f32.partialorder %v1033_v28, 0.0  ;;  %v1161_v38 = vmul.f32 0.2, %v1033_v28 }
 0x10c   :  { %1935 = vst [vmem:[#allocation3 + $0x68] sm:$0xff] %v1831_v29   ;;  %v1826_v40 = vpack.c.bf16 %v1193_v37, %v1192_v25  ;;  %vm1070_vm9 = vcmp.ge.f32.partialorder %v1006_v31, 0.0  ;;  %v1134_v41 = vmul.f32 0.2, %v1006_v31  ;;  %vm1102_vm10 = vcmp.ge.f32.partialorder %v1038_v32, 0.0 }
 0x10d   :  { %1951 = vst [vmem:[#allocation3 + $0xe8] sm:$0xff] %v1911_v36   ;;  %v1225_v42 = vsel %vm1097_vm8, %v1033_v28, %v1161_v38  ;;  %v1166_v43 = vmul.f32 0.2, %v1038_v32  ;;  %v1004_v44 = vadd.f32 %v2279_v34, %v631_v19  ;;  %v1036_v46 = vadd.f32 %v2279_v34, %v759_v20 }
 0x10e   :  { %1934 = vst [vmem:[#allocation3 + $0x60] sm:$0xff] %v1826_v40   ;;  %v1906_v45 = vpack.c.bf16 %v1225_v42, %v1224_v39  ;;  %v1007_v47 = vadd.f32 %v2023_v33, %v2279_v34  ;;  %v1039_v48 = vadd.f32 %v2055_v35, %v2279_v34  ;;  %v1198_v51 = vsel %vm1070_vm9, %v1006_v31, %v1134_v41 }
 0x10f   :  { %v1230_v52 = vsel %vm1102_vm10, %v1038_v32, %v1166_v43  ;;  %v1132_v54 = vmul.f32 0.2, %v1004_v44  ;;  %v1005_v56 = vadd.f32 %v2279_v34, %v634_v49  ;;  %v1037_v57 = vadd.f32 %v2279_v34, %v762_v50 }
 0x110   :  { %1950 = vst [vmem:[#allocation3 + $0xe0] sm:$0xff] %v1906_v45   ;;  %vm1071_vm11 = vcmp.ge.f32.partialorder %v1007_v47, 0.0  ;;  %v1135_v53 = vmul.f32 0.2, %v1007_v47  ;;  %vm1103_vm12 = vcmp.ge.f32.partialorder %v1039_v48, 0.0  ;;  %vm1068_vm13 = vcmp.ge.f32.partialorder %v1004_v44, 0.0 }
 0x111   :  { %v1167_v55 = vmul.f32 0.2, %v1039_v48  ;;  %vm1100_vm14 = vcmp.ge.f32.partialorder %v1036_v46, 0.0  ;;  %v1164_v58 = vmul.f32 0.2, %v1036_v46  ;;  %vm1069_vm15 = vcmp.ge.f32.partialorder %v1005_v56, 0.0 }
 0x112   :  { %v1199_v59 = vsel %vm1071_vm11, %v1007_v47, %v1135_v53  ;;  %v1133_v62 = vmul.f32 0.2, %v1005_v56  ;;  %vm1101_vm0 = vcmp.ge.f32.partialorder %v1037_v57, 0.0  ;;  %v1165_v0 = vmul.f32 0.2, %v1037_v57 }
 0x113   :  { %v1841_v60 = vpack.c.bf16 %v1199_v59, %v1198_v51  ;;  %v1231_v61 = vsel %vm1103_vm12, %v1039_v48, %v1167_v55  ;;  %v1196_v1 = vsel %vm1068_vm13, %v1004_v44, %v1132_v54  ;;  %v1228_v3 = vsel %vm1100_vm14, %v1036_v46, %v1164_v58 }
 0x114   :  { %v1921_v63 = vpack.c.bf16 %v1231_v61, %v1230_v52  ;;  %v1197_v2 = vsel %vm1069_vm15, %v1005_v56, %v1133_v62  ;;  %v1229_v34 = vsel %vm1101_vm0, %v1037_v57, %v1165_v0 }
 0x115   :  { %1937 = vst [vmem:[#allocation3 + $0x78] sm:$0xff] %v1841_v60   ;;  %v1836_v4 = vpack.c.bf16 %v1197_v2, %v1196_v1  ;;  %v1916_v5 = vpack.c.bf16 %v1229_v34, %v1228_v3 }
 0x116   :  { %1953 = vst [vmem:[#allocation3 + $0xf8] sm:$0xff] %v1921_v63  }
 0x117   :  { %1936 = vst [vmem:[#allocation3 + $0x70] sm:$0xff] %v1836_v4   ;;  %1952 = vst [vmem:[#allocation3 + $0xf0] sm:$0xff] %v1916_v5  }
 0x118   :  { %2108 = shalt.err (!%p2105_p4)
}
 0x119   :  { %s2120_s26 = smov 64   ;;  %s2121_s27 = smov 4  }
 0x11a   :  { %1563 = dma.vmem_to_hbm [thread:$0]  %s1558_s2, 4096, %s2354_s3, [#allocation4], %s2120_s26, %s2120_s26, %s2121_s27  }
 0x11b   :  { %2117 = dma.done.wait [#allocation4], 4096  }
 0x11c   :  { %2118 = vsyncadd [#allocation4], 4294963200 }
 0x11d   :  { %1567 = vsyncpa [#allocation4], 1 }

</bundles_post_ra>
